<compile_context>
chip_gen: v6e
topology: v6e:2x2x1
jax: 0.10.0
libtpu: 0.0.40
codegen_flags: <defaults>
</compile_context>

<pallas_src>
from functools import partial

import jax
import jax.numpy as jnp
from jax.experimental import pallas as pl
from jax.experimental.pallas import tpu as pltpu


# ---------------------------------------------------------------------------
# helpers
# ---------------------------------------------------------------------------
def _round_up(x, m):
    return ((x + m - 1) // m) * m


def _sublane_multiple(dtype):
    # sublane packing granularity: 8 for 32-bit, 16 for 16-bit, 32 for 8-bit
    return {4: 8, 2: 16, 1: 32}.get(jnp.dtype(dtype).itemsize, 8)


def _vmem_capacity_bytes():
    """Physical VMEM of the current chip; conservative fallback (v7x = 64 MiB)."""
    try:
        info = pltpu.get_tpu_info()
        cap = int(getattr(info, "vmem_capacity_bytes", 0) or 0)
        if cap > 0:
            return cap
    except Exception:
        pass
    return 64 * 1024 * 1024


def _pick_batch_tile(n, cap=128):
    """Multiple-of-8 divisor of n (or full n), <= cap, preferring >=2 grid steps."""
    if n <= 8:
        return n
    t = min(cap, n)
    t -= t % 8
    best = None
    while t >= 8:
        if n % t == 0:
            best = t
            break
        t -= 8
    if best is None:
        return n                      # no aligned divisor -> single full block
    if best == n and n >= 16 and (n // 2) % 8 == 0:
        best = n // 2                 # >=2 steps so "parallel" can use both v7x cores
    return best


def _pick_channel_tile(c, cap, sub):
    """Channel (reduction) tile: multiple of `sub`, <= cap. Returns (tc, extra_pad)."""
    cap = max(sub, (cap // sub) * sub)
    if c <= cap:
        return c, 0                   # full dim (legal even if not sub-aligned)
    t = cap
    while t >= sub:
        if c % t == 0:
            return t, 0
        t -= sub
    tc = cap                          # ragged C: pad channels with zeros in the wrapper
    return tc, _round_up(c, tc) - c


# ---------------------------------------------------------------------------
# Fused kernel: global-avg-pool (over H*W) + Linear (matmul + bias)
# ---------------------------------------------------------------------------
def _decoder_kernel(inv_hw, tc, weight_resident,
                    x_ref, w_ref, b_ref, o_ref, acc_ref):
    # x_ref  : (tn, tc, HW)        activation tile, spatial on the lane axis
    # w_ref  : (C, K) or (tc, K)   Linear weight (in_features, out_features), native dtype
    # b_ref  : (1, K) f32          Linear bias
    # o_ref  : (tn, K)             output tile
    # acc_ref: (tn, K) f32         VMEM accumulator across the channel-reduction axis
    j = pl.program_id(1)

    @pl.when(j == 0)
    def _init():
        acc_ref[...] = jnp.zeros_like(acc_ref)

    # Global average pool over HW: VPU vreg adds + a single lane reduce (XLU).
    # NOTE: on v7x, if profiling ever shows the XLU lane-reduce binding ahead of
    # the 3.2 TB/s HBM stream, this can be routed through the otherwise-idle MXU.
    pooled = jnp.sum(x_ref[...].astype(jnp.float32), axis=-1) * inv_hw   # (tn, tc)

    if weight_resident:
        c0 = pl.multiple_of(j * tc, tc)
        w = w_ref[pl.ds(c0, tc), :]
    else:
        w = w_ref[...]

    acc_ref[...] += jnp.dot(pooled, w.astype(jnp.float32),
                            preferred_element_type=jnp.float32)

    # Bias + store only once, in the epilogue of the channel reduction.
    @pl.when(j == pl.num_programs(1) - 1)
    def _finalize():
        o_ref[...] = (acc_ref[...] + b_ref[...]).astype(o_ref.dtype)


# ---------------------------------------------------------------------------
# Wrapper: PyTorch-facing API (NCHW input, Linear weight (n_classes, in_features))
# ---------------------------------------------------------------------------
def resnet_decoder(x_nchw, weight, bias):
    """ResnetDecoder.forward: AdaptiveAvgPool2d((1,1)) -> flatten -> Linear.

    x_nchw: (N, C, H, W);  weight: (n_classes, C);  bias: (n_classes,).
    """
    N, C, H, W = x_nchw.shape
    K = weight.shape[0]
    assert weight.shape[1] == C, (weight.shape, C)
    HW = H * W

    x_dt = x_nchw.dtype
    x_itemsize = jnp.dtype(x_dt).itemsize
    w_itemsize = jnp.dtype(weight.dtype).itemsize
    sub_x = _sublane_multiple(x_dt)
    sub_w = _sublane_multiple(weight.dtype)
    hw_pad = _round_up(HW, 128)          # lane padding of the x block
    k_pad = _round_up(K, 128)            # lane padding of weight / output / acc

    # --- generation-aware VMEM budgets ---------------------------------------
    vmem_cap = _vmem_capacity_bytes()
    if vmem_cap >= 96 * 1024 * 1024:     # v5e / v6e: 128 MiB physical VMEM
        x_block_budget = 12 * 1024 * 1024
        vmem_limit = 64 * 1024 * 1024
    else:                                # v7x: 64 MiB physical VMEM
        x_block_budget = 10 * 1024 * 1024
        vmem_limit = 44 * 1024 * 1024

    # --- tile selection (padding-aware footprints) ----------------------------
    tn = _pick_batch_tile(N, cap=128)
    tc_cap = max(sub_x, x_block_budget // max(1, tn * hw_pad * x_itemsize))
    tc, c_extra = _pick_channel_tile(C, tc_cap, sub_x)
    c_pad = C + c_extra
    tc_pad = _round_up(tc, sub_x)
    x_block_bytes = tn * tc_pad * hw_pad * x_itemsize

    # --- weight residency: keep full (C, K) weight in VMEM when it fits -------
    w_full_bytes = _round_up(c_pad, sub_w) * k_pad * w_itemsize
    misc_bytes = 4 * _round_up(tn, 8) * k_pad * 4 + 2 * k_pad * 4  # acc + out + bias
    weight_resident = (
        w_full_bytes <= 8 * 1024 * 1024
        and 2 * x_block_bytes + w_full_bytes + misc_bytes <= vmem_limit
    )

    # --- operand plumbing (layout only; weight/x stay in native dtype) --------
    x3 = x_nchw.reshape(N, C, HW)                    # spatial -> lane axis
    w_t = jnp.transpose(weight, (1, 0))              # (C, K), native dtype
    if c_extra:
        # Zero padding is exact: padded channels add 0 to the pool and matmul.
        x3 = jnp.pad(x3, ((0, 0), (0, c_extra), (0, 0)))
        w_t = jnp.pad(w_t, ((0, c_extra), (0, 0)))
    b2 = bias.reshape(1, K).astype(jnp.float32)

    grid = (N // tn, c_pad // tc)

    if weight_resident:
        w_spec = pl.BlockSpec((c_pad, K), lambda i, j: (0, 0))   # DMA'd once, sliced in-kernel
    else:
        w_spec = pl.BlockSpec((tc, K), lambda i, j: (j, 0))

    cost = pl.CostEstimate(
        flops=int(N * c_pad * HW + 2 * N * c_pad * K),
        transcendentals=0,
        bytes_accessed=int(
            N * c_pad * HW * x_itemsize
            + (1 if weight_resident else grid[0]) * c_pad * K * w_itemsize
            + K * 4
            + N * K * x_itemsize
        ),
    )

    out = pl.pallas_call(
        partial(_decoder_kernel, float(1.0 / HW), tc, weight_resident),
        out_shape=jax.ShapeDtypeStruct((N, K), x_dt),
        grid_spec=pltpu.PrefetchScalarGridSpec(
            num_scalar_prefetch=0,
            grid=grid,
            in_specs=[
                pl.BlockSpec((tn, tc, HW), lambda i, j: (i, j, 0)),
                w_spec,
                pl.BlockSpec((1, K), lambda i, j: (0, 0)),
            ],
            out_specs=pl.BlockSpec((tn, K), lambda i, j: (i, 0)),
            scratch_shapes=[pltpu.VMEM((tn, K), jnp.float32)],
        ),
        compiler_params=pltpu.CompilerParams(
            dimension_semantics=("parallel", "arbitrary"),
            vmem_limit_bytes=vmem_limit,
        ),
        cost_estimate=cost,
    )(x3, w_t, b2)
    return out


# ---------------------------------------------------------------------------
# Deterministic parameter construction (synthetic, nn.Linear-like scale)
# ---------------------------------------------------------------------------
def make_decoder_params(key, in_features, n_classes):
    kw, kb = jax.random.split(key)
    weight = jax.random.normal(kw, (n_classes, in_features), jnp.float32) / jnp.sqrt(in_features)
    bias = 0.1 * jax.random.normal(kb, (n_classes,), jnp.float32)
    return weight, bias


if __name__ == "__main__":
    key = jax.random.PRNGKey(0)
    kx, kp = jax.random.split(key)

    N, C, H, W = 2, 4, 16, 16          # small NCHW input, C == in_features
    N_CLASSES = 8

    x = jax.random.normal(kx, (N, C, H, W), jnp.float32)
    weight, bias = make_decoder_params(kp, C, N_CLASSES)

    out = jax.block_until_ready(resnet_decoder(x, weight, bias))

    # Pure-JAX reference: AdaptiveAvgPool2d((1,1)) -> flatten -> Linear.
    ref = jnp.mean(x, axis=(2, 3)) @ weight.T + bias

    assert out.shape == (N, N_CLASSES), (out.shape, (N, N_CLASSES))
    assert bool(jnp.all(jnp.isfinite(out)))
    assert bool(jnp.allclose(out, ref, atol=1e-4, rtol=1e-4)), float(
        jnp.max(jnp.abs(out - ref))
    )
    print("KERNEL_OK")
</pallas_src>

<mosaic_0001>
module attributes {stable_mosaic.version = 11 : i64} {
  func.func @_decoder_kernel(%arg0: i32, %arg1: i32, %arg2: memref<2x4x256xf32, #tpu.memory_space<vmem>>, %arg3: memref<4x8xf32, #tpu.memory_space<vmem>>, %arg4: memref<1x8xf32, #tpu.memory_space<vmem>>, %arg5: memref<2x8xf32, #tpu.memory_space<vmem>>, %arg6: memref<2x8xf32, #tpu.memory_space<vmem>>) attributes {dimension_semantics = [#tpu.dimension_semantics<parallel>, #tpu.dimension_semantics<arbitrary>], iteration_bounds = array<i64: 1, 1>, scalar_prefetch = 0 : i64, scratch_operands = 1 : i64, tpu.core_type = #tpu.core_type<tc>, window_params = [{transform_indices = @transform_0, window_bounds = array<i64: 2, 4, 256>}, {pipeline_mode = #tpu.pipeline_mode<synchronous>, transform_indices = @transform_1, window_bounds = array<i64: 4, 8>}, {pipeline_mode = #tpu.pipeline_mode<synchronous>, transform_indices = @transform_2, window_bounds = array<i64: 1, 8>}, {transform_indices = @transform_3, window_bounds = array<i64: 2, 8>}]} {
    %c0_i32 = arith.constant 0 : i32
    %0 = arith.cmpi eq, %arg1, %c0_i32 : i32
    %1 = arith.extui %0 : i1 to i32
    %c0_i32_0 = arith.constant 0 : i32
    %2 = arith.cmpi ne, %1, %c0_i32_0 : i32
    scf.if %2 {
      %cst_12 = arith.constant 0.000000e+00 : f32
      %18 = vector.broadcast %cst_12 : f32 to vector<2x8xf32>
      %c0_13 = arith.constant 0 : index
      %c0_14 = arith.constant 0 : index
      %19 = vector.load %arg6[%c0_13, %c0_14] : memref<2x8xf32, #tpu.memory_space<vmem>>, vector<2x8xf32>
      tpu.vector_store %arg6[%c0_13, %c0_14], %18 {strides = array<i32>} : memref<2x8xf32, #tpu.memory_space<vmem>>, vector<2x8xf32>,
    } else {
    }
    %c0 = arith.constant 0 : index
    %c0_1 = arith.constant 0 : index
    %c0_2 = arith.constant 0 : index
    %3 = vector.load %arg2[%c0, %c0_1, %c0_2] : memref<2x4x256xf32, #tpu.memory_space<vmem>>, vector<2x4x256xf32>
    %cst = arith.constant dense<0.000000e+00> : vector<2x4xf32>
    %4 = vector.multi_reduction <add>, %3, %cst [2] : vector<2x4x256xf32> to vector<2x4xf32>
    %cst_3 = arith.constant 3.906250e-03 : f32
    %5 = vector.broadcast %cst_3 : f32 to vector<2x4xf32>
    %6 = arith.mulf %4, %5 : vector<2x4xf32>
    %c4_i32 = arith.constant 4 : i32
    %7 = arith.muli %arg1, %c4_i32 : i32
    %8 = tpu.assume_multiple %7, 4 : i32
    %9 = arith.index_cast %8 : i32 to index
    %c0_4 = arith.constant 0 : index
    %10 = vector.load %arg3[%9, %c0_4] : memref<4x8xf32, #tpu.memory_space<vmem>>, vector<4x8xf32>
    %c0_5 = arith.constant 0 : index
    %c0_6 = arith.constant 0 : index
    %11 = vector.load %arg6[%c0_5, %c0_6] : memref<2x8xf32, #tpu.memory_space<vmem>>, vector<2x8xf32>
    %cst_7 = arith.constant dense<0.000000e+00> : vector<2x8xf32>
    %12 = tpu.matmul %6, %10, %cst_7 {dimension_numbers = #tpu.dot_dimension_numbers<[1], [0], [0], [1], [0, 0, 1, 1], [], []>} : vector<2x4xf32>, vector<4x8xf32>, vector<2x8xf32> -> vector<2x8xf32>
    %13 = arith.addf %11, %12 : vector<2x8xf32>
    %c0_8 = arith.constant 0 : index
    %c0_9 = arith.constant 0 : index
    %14 = vector.load %arg6[%c0_8, %c0_9] : memref<2x8xf32, #tpu.memory_space<vmem>>, vector<2x8xf32>
    tpu.vector_store %arg6[%c0_8, %c0_9], %13 {strides = array<i32>} : memref<2x8xf32, #tpu.memory_space<vmem>>, vector<2x8xf32>,
    %c0_i32_10 = arith.constant 0 : i32
    %15 = arith.cmpi eq, %arg1, %c0_i32_10 : i32
    %16 = arith.extui %15 : i1 to i32
    %c0_i32_11 = arith.constant 0 : i32
    %17 = arith.cmpi ne, %16, %c0_i32_11 : i32
    scf.if %17 {
      %c0_12 = arith.constant 0 : index
      %c0_13 = arith.constant 0 : index
      %18 = vector.load %arg6[%c0_12, %c0_13] : memref<2x8xf32, #tpu.memory_space<vmem>>, vector<2x8xf32>
      %c0_14 = arith.constant 0 : index
      %c0_15 = arith.constant 0 : index
      %19 = vector.load %arg4[%c0_14, %c0_15] : memref<1x8xf32, #tpu.memory_space<vmem>>, vector<1x8xf32>
      %20 = vector.broadcast %19 : vector<1x8xf32> to vector<2x8xf32>
      %21 = arith.addf %18, %20 : vector<2x8xf32>
      %c0_16 = arith.constant 0 : index
      %c0_17 = arith.constant 0 : index
      %22 = vector.load %arg5[%c0_16, %c0_17] : memref<2x8xf32, #tpu.memory_space<vmem>>, vector<2x8xf32>
      tpu.vector_store %arg5[%c0_16, %c0_17], %21 {strides = array<i32>} : memref<2x8xf32, #tpu.memory_space<vmem>>, vector<2x8xf32>,
    } else {
    }
    return
  }
  func.func @transform_0(%arg0: i32, %arg1: i32) -> (i32, i32, i32) {
    %c0_i32 = arith.constant 0 : i32
    %c0_i32_0 = arith.constant 0 : i32
    return %arg0, %arg1, %c0_i32 : i32, i32, i32
  }
  func.func @transform_1(%arg0: i32, %arg1: i32) -> (i32, i32) {
    %c0_i32 = arith.constant 0 : i32
    %c0_i32_0 = arith.constant 0 : i32
    %c0_i32_1 = arith.constant 0 : i32
    return %c0_i32, %c0_i32_0 : i32, i32
  }
  func.func @transform_2(%arg0: i32, %arg1: i32) -> (i32, i32) {
    %c0_i32 = arith.constant 0 : i32
    %c0_i32_0 = arith.constant 0 : i32
    %c0_i32_1 = arith.constant 0 : i32
    return %c0_i32, %c0_i32_0 : i32, i32
  }
  func.func @transform_3(%arg0: i32, %arg1: i32) -> (i32, i32) {
    %c0_i32 = arith.constant 0 : i32
    %c0_i32_0 = arith.constant 0 : i32
    return %arg0, %c0_i32 : i32, i32
  }
}

</mosaic_0001>

<bundles_post_ra>
// kernel: tpu_custom_call.1
= control target key start
LH: loop header
LB: loop body
LE: loop exit
PB: predicated region body
PF: predicated region fallthrough
CT: control target
= control target key end

     0   :  { %8 = vsyncpa [#allocation4], 0  ;;  %s326_s0 = inlined_call_operand.hbm [shape: f32[2,4,256], index: 0, kind: input, shape index: {}]   ;;  %s327_s1 = inlined_call_operand.hbm [shape: f32[4,8], index: 1, kind: input, shape index: {}]   ;;  %s328_s2 = inlined_call_operand.vmem [shape: f32[1,8], index: 2, kind: input, shape index: {}]   ;;  %s329_s3 = inlined_call_operand.hbm [shape: f32[2,8], index: 3, kind: output, shape index: {}]  }
   0x1   :  { %9 = vsyncpa [#allocation7], 0 }
   0x2   :  { %10 = vsyncpa [#allocation5], 0  ;;  %s279_s12 = smov [#allocation3]  }
   0x3   :  { %s16_s13 = sshll.u32 %s279_s12, 4  ;;  %s17_s13 = int_to_ptr.vmem [resolvable:$true] %s16_s13 }
   0x4   :  { %s221_s14 = scalar_lea.vmem %s17_s13, 256  ;;  %p226_p1 = scmp.lt.s32.totalorder %s17_s13, %s17_s13 }
   0x5   :  { %p222_p0 = scmp.ne.s32.totalorder %s17_s13, %s221_s14  ;;  %p227_p2 = scmp.lt.s32.totalorder %s221_s14, %s221_s14 }
   0x7   :  { %p228_p3 = por %p227_p2, %p226_p1 }
   0x9   :  { %p229_p4 = pnand %p228_p3, %p222_p0 }
   0xb   :  { %232 = shalt.err (!%p229_p4)
}
   0xc   :  { %s280_s15 = smov 128   ;;  %s281_s16 = smov 8  }
   0xd   :  { %22 = dma.hbm_to_vmem [thread:$0]  %s326_s0, 256, %s17_s13, [#allocation4], %s280_s15, %s280_s15, %s281_s16  }
   0xe   :  { %s282_s19 = smov [#allocation6]  }
   0xf   :  { %s29_s20 = sshll.u32 %s282_s19, 4  ;;  %s30_s20 = int_to_ptr.vmem [resolvable:$true] %s29_s20 }
  0x10   :  { %s241_s21 = scalar_lea.vmem %s30_s20, 64  ;;  %p246_p6 = scmp.lt.s32.totalorder %s30_s20, %s30_s20 }
  0x11   :  { %p242_p5 = scmp.ne.s32.totalorder %s30_s20, %s241_s21  ;;  %p247_p7 = scmp.lt.s32.totalorder %s241_s21, %s241_s21 }
  0x13   :  { %p248_p8 = por %p247_p7, %p246_p6 }
  0x15   :  { %p249_p9 = pnand %p248_p8, %p242_p5 }
  0x17   :  { %252 = shalt.err (!%p249_p9)
}
  0x18   :  { %32 = dma.hbm_to_vmem [thread:$0]  %s327_s1, 64, %s30_s20, [#allocation7]  }
  0x19   :  { %273 = dma.done.wait [#allocation4], 256  }
  0x1a   :  { %274 = vsyncadd [#allocation4], 4294967040 }
  0x1b   :  { %275 = dma.done.wait [#allocation7], 64  }
  0x1c   :  { %276 = vsyncadd [#allocation7], 4294967232  ;;  %vm55_vm0 = vcmask 1043456   ;;  %v47_v0 = vld [vmem:[#allocation3] sm:$0xff]  ;;  %v48_v1 = vld [vmem:[#allocation3 + $0x8] sm:$0xff]  ;;  %vm45_vm1 = vcmask 58368   ;;  %v74_v12 = vlaneseq }
  0x1d   :  { %v51_v2 = vcombine.high %v47_v0, %v47_v0  ;;  %v56_v3 = vsel %vm55_vm0, %v47_v0, 0.0  ;;  %v52_v4 = vcombine.high %v48_v1, %v48_v1  ;;  %v61_v6 = vsel %vm55_vm0, %v48_v1, 0.0  ;;  %v70_v10 = vld [vmem:[#allocation6] sm:$0xf]  ;;  %v196_v27 = vld [vmem:[%s328_s2] ss:$0 sm:$0xff] }
  0x1e   :  { %v283_v11 = vmov 0.0   ;;  %vm284_vm2 = vmmov 0   ;;  %v75_v13 = vand.u32 127, %v74_v12  ;;  %v77_v14 = vshrl.u32 %v74_v12, 7  ;;  %s285_s24 = smov [#allocation8]  }
  0x1f   :  { %v57_v5 = vsel %vm55_vm0, %v51_v2, 0.0  ;;  %v62_v7 = vsel %vm55_vm0, %v52_v4, 0.0  ;;  %46 = vst.msk [vmem:[#allocation2] sm:$0x3] %vm45_vm1, %v283_v11  ;;  %199 = vmatprep.subr.mxu0 %v283_v11  ;;  %201 = vmatprep.mubr.msk.f32.mxu0 %vm284_vm2, %v283_v11  ;;  %vm84_vm3 = vcmask 1041409   ;;  %vm86_vm4 = vcmask 31744  }
  0x20   :  { %v58_v8 = vadd.f32 %v57_v5, %v56_v3  ;;  %v63_v9 = vadd.f32 %v62_v7, %v61_v6  ;;  %200 = vmatpush3.msk.msra.mxu0 %vm55_vm0, %v70_v10  ;;  %v78_v16 = vsub.s32 %v75_v13, %v77_v14  ;;  %s184_s25 = sshll.u32 %s285_s24, 4  ;;  %s185_s25 = int_to_ptr.vmem [resolvable:$true] %s184_s25 }
  0x21   :  { %s253_s26 = scalar_lea.vmem %s185_s25, 32  ;;  %p258_p11 = scmp.lt.s32.totalorder %s185_s25, %s185_s25 }
  0x22   :  { %59 = vadd.xlane.f32.xlu0 %v58_v8  ;;  %p254_p10 = scmp.ne.s32.totalorder %s185_s25, %s253_s26  ;;  %p259_p12 = scmp.lt.s32.totalorder %s253_s26, %s253_s26 }
  0x24   :  { %p260_p13 = por %p259_p12, %p258_p11 }
  0x26   :  { %64 = vadd.xlane.f32.xlu0 %v63_v9  ;;  %v71_v23 = vld [vmem:[#allocation2] sm:$0x3]  ;;  %p261_p0 = pnand %p260_p13, %p254_p10 }
  0xab   :  { %v60_v15 = vpop.xlane.xlu0 %59 }
  0xac   :  { %v66_v17 = vmul.f32 0.00390625, %v60_v15 }
  0xae   :  { %v79_v20 = vrot.slane %v66_v17, %v78_v16 }
  0xaf   :  { %v65_v18 = vpop.xlane.xlu0 %64 }
  0xb0   :  { %v67_v19 = vmul.f32 0.00390625, %v65_v18 }
  0xb2   :  { %v83_v21 = vrot.slane %v67_v19, %v78_v16 }
  0xb4   :  { %v85_v22 = vsel %vm84_vm3, %v83_v21, %v79_v20 }
  0xb5   :  { %202 = vmatmul.mubr.msk.f32.vlgmr.msra.gmra.mxu0 %vm86_vm4, %v85_v22 }
 0x175   :  { %v158_v24 = vpop.f32.mrf.mxu0 }
 0x176   :  { %v162_v25 = vadd.f32 %v158_v24, %v71_v23 }
 0x177   :  { %v203_v26 = vpop.f32.mrf.mxu0 }
 0x178   :  { %164 = vst.msk [vmem:[#allocation2] sm:$0x3] %vm45_vm1, %v162_v25 }
 0x17f   :  { %v168_v28 = vld [vmem:[#allocation2] sm:$0x3] }
 0x180   :  { %v176_v29 = vadd.f32 %v196_v27, %v168_v28 }
 0x182   :  { %177 = vst.msk [vmem:[#allocation8] sm:$0x3] %vm45_vm1, %v176_v29 }
 0x183   :  { %264 = shalt.err (!%p261_p0)
}
 0x184   :  { %187 = dma.vmem_to_hbm [thread:$0]  %s185_s25, 32, %s329_s3, [#allocation5]  }
 0x185   :  { %277 = dma.done.wait [#allocation5], 32  }
 0x186   :  { %278 = vsyncadd [#allocation5], 4294967264 }
 0x187   :  { %191 = vsyncpa [#allocation4], 1 }
 0x188   :  { %192 = vsyncpa [#allocation7], 1 }
 0x189   :  { %193 = vsyncpa [#allocation5], 1 }

</bundles_post_ra>
